<compile_context>
chip_gen: v7x
topology: tpu7x:2x2x1
jax: 0.10.0
libtpu: 0.0.40
codegen_flags: <defaults>
</compile_context>

<pallas_src>
import functools
import math

import jax
import jax.numpy as jnp
from jax import lax
from jax.experimental import pallas as pl
from jax.experimental.pallas import tpu as pltpu


def _silu(v):
    return v * jax.nn.sigmoid(v)


def _round_up(n, m):
    return ((n + m - 1) // m) * m


def _jacobi_kan_kernel(x_ref, w_ref, gamma_ref, beta_ref, out_ref, stacked_ref,
                       *, a, b, degree, out_dim, eps):
    """One row-tile of the JacobiKAN forward.

    x_ref:       (TB, Ipad)            padded input tile
    w_ref:       ((D+2)*Ipad, Opad)    [base_w^T ; coeffs_0 ; ... ; coeffs_D]
    gamma_ref:   (1, Opad)             LayerNorm weight (zero-padded)
    beta_ref:    (1, Opad)             LayerNorm bias   (zero-padded)
    out_ref:     (TB, Opad)
    stacked_ref: (TB, (D+2)*Ipad)      VMEM scratch holding all K-slabs
    """
    i_pad = x_ref.shape[1]
    o_pad = out_ref.shape[1]

    x = x_ref[...]                                       # (TB, Ipad) f32

    # ---- slab 0: base branch operand silu(x) ----
    stacked_ref[:, 0:i_pad] = _silu(x)

    # ---- slabs 1..D+1: Jacobi polynomials of tanh(x) ----
    xt = jnp.tanh(x)

    p_km2 = jnp.ones_like(xt)                            # P_0 = 1
    stacked_ref[:, i_pad:2 * i_pad] = p_km2

    p_km1 = p_km2
    if degree > 0:
        # P_1 = (a - b + (a + b + 2) * x) / 2
        p_km1 = (a - b + (a + b + 2.0) * xt) * 0.5
        stacked_ref[:, 2 * i_pad:3 * i_pad] = p_km1

    for k in range(2, degree + 1):
        theta_k = (2 * k + a + b) * (2 * k + a + b - 1) / (2 * k * (k + a + b))
        theta_k1 = ((2 * k + a + b - 1) * (a * a - b * b)
                    / (2 * k * (k + a + b) * (2 * k + a + b - 2)))
        theta_k2 = ((k + a - 1) * (k + b - 1) * (2 * k + a + b)
                    / (k * (k + a + b) * (2 * k + a + b - 2)))
        p_k = (theta_k * xt + theta_k1) * p_km1 - theta_k2 * p_km2
        stacked_ref[:, (k + 1) * i_pad:(k + 2) * i_pad] = p_k
        p_km2, p_km1 = p_km1, p_k

    # ---- one big MXU matmul: z = [silu(x) | P_0 | ... | P_D] @ W_combined ----
    z = jnp.dot(stacked_ref[...], w_ref[...],
                preferred_element_type=jnp.float32)      # (TB, Opad)

    # ---- LayerNorm over the TRUE output_dim, then SiLU ----
    # Padded output columns of z are exactly zero (zero weight columns), so the
    # row sum already equals the sum over the true columns.
    inv_n = 1.0 / float(out_dim)
    mean = jnp.sum(z, axis=-1, keepdims=True) * inv_n
    d = z - mean
    if o_pad > out_dim:
        lane = lax.broadcasted_iota(jnp.int32, z.shape, 1)
        d = jnp.where(lane < out_dim, d, 0.0)
    var = jnp.sum(d * d, axis=-1, keepdims=True) * inv_n
    zn = (z - mean) * lax.rsqrt(var + eps)
    zn = zn * gamma_ref[...] + beta_ref[...]
    out_ref[...] = _silu(zn)


def jacobi_kan_forward(x, base_weights, jacobi_coeffs, ln_gamma, ln_beta,
                       *, a=1.0, b=1.0, eps=1e-5, tile_rows=256):
    """x: (..., input_dim). Returns (B, output_dim), B = prod(leading dims)."""
    output_dim, input_dim = base_weights.shape
    degree = jacobi_coeffs.shape[-1] - 1

    i_pad = _round_up(input_dim, 128)
    o_pad = _round_up(output_dim, 128)
    n_slabs = degree + 2                      # silu(x) slab + (degree+1) polys
    k_total = n_slabs * i_pad

    # ---- flatten rows, choose row tile, pad rows + features ----
    x2 = jnp.reshape(x, (-1, input_dim)).astype(jnp.float32)
    B = x2.shape[0]
    b8 = max(8, _round_up(B, 8))
    TB = min(_round_up(int(tile_rows), 8), b8)

    # keep the per-step VMEM footprint within a conservative budget (v7x: 64MiB)
    def _vmem_estimate(tb):
        return 4 * (2 * tb * i_pad          # x tile, double-buffered
                    + 2 * tb * o_pad        # out tile, double-buffered
                    + tb * k_total          # stacked scratch (single buffer)
                    + 2 * k_total * o_pad   # combined weights, double-buffered
                    + 4 * o_pad)            # gamma/beta
    while TB > 8 and _vmem_estimate(TB) > (28 << 20):
        TB = max(8, ((TB // 2) // 8) * 8)

    Bp = _round_up(B, TB)
    x2 = jnp.pad(x2, ((0, Bp - B), (0, i_pad - input_dim)))

    # ---- combined weight: slab 0 = base_weights^T, slabs 1.. = coeffs[d] ----
    w = jnp.zeros((n_slabs, i_pad, o_pad), jnp.float32)
    w = w.at[0, :input_dim, :output_dim].set(
        jnp.transpose(base_weights).astype(jnp.float32))
    w = w.at[1:, :input_dim, :output_dim].set(
        jnp.transpose(jacobi_coeffs, (2, 0, 1)).astype(jnp.float32))
    w = jnp.reshape(w, (k_total, o_pad))

    gamma = jnp.zeros((1, o_pad), jnp.float32).at[0, :output_dim].set(
        ln_gamma.astype(jnp.float32))
    beta = jnp.zeros((1, o_pad), jnp.float32).at[0, :output_dim].set(
        ln_beta.astype(jnp.float32))

    kernel = functools.partial(_jacobi_kan_kernel, a=float(a), b=float(b),
                               degree=int(degree), out_dim=int(output_dim),
                               eps=float(eps))

    vmem_limit = int(min(max(_vmem_estimate(TB) + (4 << 20), 16 << 20),
                         100 << 20))

    out = pl.pallas_call(
        kernel,
        out_shape=jax.ShapeDtypeStruct((Bp, o_pad), jnp.float32),
        grid_spec=pltpu.PrefetchScalarGridSpec(
            num_scalar_prefetch=0,
            grid=(Bp // TB,),
            in_specs=[
                pl.BlockSpec((TB, i_pad), lambda i: (i, 0)),
                pl.BlockSpec((k_total, o_pad), lambda i: (0, 0)),
                pl.BlockSpec((1, o_pad), lambda i: (0, 0)),
                pl.BlockSpec((1, o_pad), lambda i: (0, 0)),
            ],
            out_specs=pl.BlockSpec((TB, o_pad), lambda i: (i, 0)),
            scratch_shapes=[pltpu.VMEM((TB, k_total), jnp.float32)],
        ),
        compiler_params=pltpu.CompilerParams(
            dimension_semantics=("parallel",),
            vmem_limit_bytes=vmem_limit),
    )(x2, w, gamma, beta)

    return out[:B, :output_dim]


def _reference_forward(x, base_weights, jacobi_coeffs, ln_gamma, ln_beta,
                       *, a=1.0, b=1.0, eps=1e-5):
    """Pure-JAX reference mirroring the PyTorch forward."""
    input_dim = base_weights.shape[1]
    degree = jacobi_coeffs.shape[-1] - 1
    x2 = jnp.reshape(x, (-1, input_dim))
    basis = _silu(x2) @ base_weights.T
    xt = jnp.tanh(x2)
    polys = [jnp.ones_like(xt)]
    if degree > 0:
        polys.append((a - b + (a + b + 2.0) * xt) * 0.5)
    for i in range(2, degree + 1):
        theta_k = (2 * i + a + b) * (2 * i + a + b - 1) / (2 * i * (i + a + b))
        theta_k1 = ((2 * i + a + b - 1) * (a * a - b * b)
                    / (2 * i * (i + a + b) * (2 * i + a + b - 2)))
        theta_k2 = ((i + a - 1) * (i + b - 1) * (2 * i + a + b)
                    / (i * (i + a + b) * (2 * i + a + b - 2)))
        polys.append((theta_k * xt + theta_k1) * polys[-1] - theta_k2 * polys[-2])
    jacobi = jnp.stack(polys, axis=-1)                       # (B, I, D+1)
    y = jnp.einsum('bid,iod->bo', jacobi, jacobi_coeffs)
    z = y + basis
    mean = jnp.mean(z, axis=-1, keepdims=True)
    var = jnp.mean(jnp.square(z - mean), axis=-1, keepdims=True)
    zn = (z - mean) * lax.rsqrt(var + eps)
    zn = zn * ln_gamma[None, :] + ln_beta[None, :]
    return _silu(zn)


if __name__ == "__main__":
    # Module hyperparameters (small, deterministic).
    input_dim, output_dim, degree = 64, 32, 3
    a_coef, b_coef = 1.0, 1.0

    key = jax.random.PRNGKey(0)
    kx, kw, kc, kx2 = jax.random.split(key, 4)

    # Input: (batch=2, channels=4, input_dim) -> flattened to (8, input_dim).
    x = jax.random.normal(kx, (2, 4, input_dim), dtype=jnp.float32)

    # base_weights: (output_dim, input_dim), xavier_uniform init.
    bound = math.sqrt(6.0 / (input_dim + output_dim))
    base_weights = jax.random.uniform(kw, (output_dim, input_dim),
                                      minval=-bound, maxval=bound,
                                      dtype=jnp.float32)

    # jacobi_coeffs: (input_dim, output_dim, degree+1), normal init.
    std = 1.0 / (input_dim * (degree + 1))
    jacobi_coeffs = std * jax.random.normal(
        kc, (input_dim, output_dim, degree + 1), dtype=jnp.float32)

    # LayerNorm parameters (default torch init: weight=1, bias=0).
    ln_gamma = jnp.ones((output_dim,), jnp.float32)
    ln_beta = jnp.zeros((output_dim,), jnp.float32)

    # --- small case (matches the module's typical flattened batch) ---
    out = jacobi_kan_forward(x, base_weights, jacobi_coeffs, ln_gamma, ln_beta,
                             a=a_coef, b=b_coef)
    out = jax.block_until_ready(out)
    ref = _reference_forward(x, base_weights, jacobi_coeffs, ln_gamma, ln_beta,
                             a=a_coef, b=b_coef)
    assert out.shape == (8, output_dim)
    assert jnp.allclose(out, ref, atol=2e-5, rtol=2e-5), "mismatch vs reference"

    # --- larger ragged batch: exercises row padding + multi-step grid ---
    xb = jax.random.normal(kx2, (300, input_dim), dtype=jnp.float32)
    out_b = jacobi_kan_forward(xb, base_weights, jacobi_coeffs, ln_gamma,
                               ln_beta, a=a_coef, b=b_coef, tile_rows=128)
    out_b = jax.block_until_ready(out_b)
    ref_b = _reference_forward(xb, base_weights, jacobi_coeffs, ln_gamma,
                               ln_beta, a=a_coef, b=b_coef)
    assert out_b.shape == (300, output_dim)
    assert jnp.allclose(out_b, ref_b, atol=2e-5, rtol=2e-5), "mismatch (big)"

    print("KERNEL_OK")
</pallas_src>

<mosaic_0001>
module attributes {stable_mosaic.version = 11 : i64} {
  func.func @_jacobi_kan_kernel(%arg0: i32, %arg1: memref<8x128xf32, #tpu.memory_space<vmem>>, %arg2: memref<640x128xf32, #tpu.memory_space<vmem>>, %arg3: memref<1x128xf32, #tpu.memory_space<vmem>>, %arg4: memref<1x128xf32, #tpu.memory_space<vmem>>, %arg5: memref<8x128xf32, #tpu.memory_space<vmem>>, %arg6: memref<8x640xf32, #tpu.memory_space<vmem>>) attributes {dimension_semantics = [#tpu.dimension_semantics<parallel>], iteration_bounds = array<i64: 1>, scalar_prefetch = 0 : i64, scratch_operands = 1 : i64, tpu.core_type = #tpu.core_type<tc>, window_params = [{transform_indices = @transform_0, window_bounds = array<i64: 8, 128>}, {pipeline_mode = #tpu.pipeline_mode<synchronous>, transform_indices = @transform_1, window_bounds = array<i64: 640, 128>}, {pipeline_mode = #tpu.pipeline_mode<synchronous>, transform_indices = @transform_2, window_bounds = array<i64: 1, 128>}, {pipeline_mode = #tpu.pipeline_mode<synchronous>, transform_indices = @transform_3, window_bounds = array<i64: 1, 128>}, {transform_indices = @transform_4, window_bounds = array<i64: 8, 128>}]} {
    %c0 = arith.constant 0 : index
    %c0_0 = arith.constant 0 : index
    %0 = vector.load %arg1[%c0, %c0_0] : memref<8x128xf32, #tpu.memory_space<vmem>>, vector<8x128xf32>
    %1 = arith.negf %0 : vector<8x128xf32>
    %2 = math.exp %1 : vector<8x128xf32>
    %cst = arith.constant 1.000000e+00 : f32
    %3 = vector.broadcast %cst : f32 to vector<8x128xf32>
    %4 = arith.addf %3, %2 : vector<8x128xf32>
    %5 = arith.divf %3, %4 : vector<8x128xf32>
    %6 = arith.mulf %0, %5 : vector<8x128xf32>
    %c0_1 = arith.constant 0 : index
    %c0_2 = arith.constant 0 : index
    %7 = vector.load %arg6[%c0_1, %c0_2] : memref<8x640xf32, #tpu.memory_space<vmem>>, vector<8x128xf32>
    tpu.vector_store %arg6[%c0_1, %c0_2], %6 {strides = array<i32>} : memref<8x640xf32, #tpu.memory_space<vmem>>, vector<8x128xf32>,
    %8 = math.tanh %0 : vector<8x128xf32>
    %cst_3 = arith.constant 1.000000e+00 : f32
    %9 = vector.broadcast %cst_3 : f32 to vector<8x128xf32>
    %c0_4 = arith.constant 0 : index
    %c128 = arith.constant 128 : index
    %10 = vector.load %arg6[%c0_4, %c128] : memref<8x640xf32, #tpu.memory_space<vmem>>, vector<8x128xf32>
    tpu.vector_store %arg6[%c0_4, %c128], %9 {strides = array<i32>} : memref<8x640xf32, #tpu.memory_space<vmem>>, vector<8x128xf32>,
    %cst_5 = arith.constant 4.000000e+00 : f32
    %11 = vector.broadcast %cst_5 : f32 to vector<8x128xf32>
    %12 = arith.mulf %11, %8 : vector<8x128xf32>
    %cst_6 = arith.constant 0.000000e+00 : f32
    %13 = vector.broadcast %cst_6 : f32 to vector<8x128xf32>
    %14 = arith.addf %13, %12 : vector<8x128xf32>
    %cst_7 = arith.constant 5.000000e-01 : f32
    %15 = vector.broadcast %cst_7 : f32 to vector<8x128xf32>
    %16 = arith.mulf %14, %15 : vector<8x128xf32>
    %c0_8 = arith.constant 0 : index
    %c256 = arith.constant 256 : index
    %17 = vector.load %arg6[%c0_8, %c256] : memref<8x640xf32, #tpu.memory_space<vmem>>, vector<8x128xf32>
    tpu.vector_store %arg6[%c0_8, %c256], %16 {strides = array<i32>} : memref<8x640xf32, #tpu.memory_space<vmem>>, vector<8x128xf32>,
    %cst_9 = arith.constant 1.875000e+00 : f32
    %18 = vector.broadcast %cst_9 : f32 to vector<8x128xf32>
    %19 = arith.mulf %18, %8 : vector<8x128xf32>
    %cst_10 = arith.constant 0.000000e+00 : f32
    %20 = vector.broadcast %cst_10 : f32 to vector<8x128xf32>
    %21 = arith.addf %19, %20 : vector<8x128xf32>
    %22 = arith.mulf %21, %16 : vector<8x128xf32>
    %cst_11 = arith.constant 7.500000e-01 : f32
    %23 = vector.broadcast %cst_11 : f32 to vector<8x128xf32>
    %24 = arith.mulf %23, %9 : vector<8x128xf32>
    %25 = arith.subf %22, %24 : vector<8x128xf32>
    %c0_12 = arith.constant 0 : index
    %c384 = arith.constant 384 : index
    %26 = vector.load %arg6[%c0_12, %c384] : memref<8x640xf32, #tpu.memory_space<vmem>>, vector<8x128xf32>
    tpu.vector_store %arg6[%c0_12, %c384], %25 {strides = array<i32>} : memref<8x640xf32, #tpu.memory_space<vmem>>, vector<8x128xf32>,
    %cst_13 = arith.constant 1.86666667 : f32
    %27 = vector.broadcast %cst_13 : f32 to vector<8x128xf32>
    %28 = arith.mulf %27, %8 : vector<8x128xf32>
    %cst_14 = arith.constant 0.000000e+00 : f32
    %29 = vector.broadcast %cst_14 : f32 to vector<8x128xf32>
    %30 = arith.addf %28, %29 : vector<8x128xf32>
    %31 = arith.mulf %30, %25 : vector<8x128xf32>
    %cst_15 = arith.constant 8.000000e-01 : f32
    %32 = vector.broadcast %cst_15 : f32 to vector<8x128xf32>
    %33 = arith.mulf %32, %16 : vector<8x128xf32>
    %34 = arith.subf %31, %33 : vector<8x128xf32>
    %c0_16 = arith.constant 0 : index
    %c512 = arith.constant 512 : index
    %35 = vector.load %arg6[%c0_16, %c512] : memref<8x640xf32, #tpu.memory_space<vmem>>, vector<8x128xf32>
    tpu.vector_store %arg6[%c0_16, %c512], %34 {strides = array<i32>} : memref<8x640xf32, #tpu.memory_space<vmem>>, vector<8x128xf32>,
    %c0_17 = arith.constant 0 : index
    %c0_18 = arith.constant 0 : index
    %36 = vector.load %arg6[%c0_17, %c0_18] : memref<8x640xf32, #tpu.memory_space<vmem>>, vector<8x640xf32>
    %c0_19 = arith.constant 0 : index
    %c0_20 = arith.constant 0 : index
    %37 = vector.load %arg2[%c0_19, %c0_20] : memref<640x128xf32, #tpu.memory_space<vmem>>, vector<640x128xf32>
    %cst_21 = arith.constant dense<0.000000e+00> : vector<8x128xf32>
    %38 = tpu.matmul %36, %37, %cst_21 {dimension_numbers = #tpu.dot_dimension_numbers<[1], [0], [0], [1], [0, 0, 1, 1], [], []>} : vector<8x640xf32>, vector<640x128xf32>, vector<8x128xf32> -> vector<8x128xf32>
    %cst_22 = arith.constant dense<0.000000e+00> : vector<8xf32>
    %39 = vector.multi_reduction <add>, %38, %cst_22 [1] : vector<8x128xf32> to vector<8xf32>
    %40 = vector.shape_cast %39 : vector<8xf32> to vector<8x1xf32>
    %cst_23 = arith.constant 3.125000e-02 : f32
    %41 = vector.broadcast %cst_23 : f32 to vector<8x1xf32>
    %42 = arith.mulf %40, %41 : vector<8x1xf32>
    %43 = vector.broadcast %42 : vector<8x1xf32> to vector<8x128xf32>
    %44 = arith.subf %38, %43 : vector<8x128xf32>
    %45 = tpu.iota {dimensions = array<i32: 1>} : vector<8x128xi32>
    %c32_i32 = arith.constant 32 : i32
    %46 = vector.broadcast %c32_i32 : i32 to vector<8x128xi32>
    %47 = arith.cmpi slt, %45, %46 : vector<8x128xi32>
    %cst_24 = arith.constant 0.000000e+00 : f32
    %48 = vector.broadcast %cst_24 : f32 to vector<8x128xf32>
    %49 = arith.select %47, %44, %48 : vector<8x128xi1>, vector<8x128xf32>
    %50 = arith.mulf %49, %49 : vector<8x128xf32>
    %cst_25 = arith.constant dense<0.000000e+00> : vector<8xf32>
    %51 = vector.multi_reduction <add>, %50, %cst_25 [1] : vector<8x128xf32> to vector<8xf32>
    %52 = vector.shape_cast %51 : vector<8xf32> to vector<8x1xf32>
    %cst_26 = arith.constant 3.125000e-02 : f32
    %53 = vector.broadcast %cst_26 : f32 to vector<8x1xf32>
    %54 = arith.mulf %52, %53 : vector<8x1xf32>
    %55 = vector.broadcast %42 : vector<8x1xf32> to vector<8x128xf32>
    %56 = arith.subf %38, %55 : vector<8x128xf32>
    %cst_27 = arith.constant 9.99999974E-6 : f32
    %57 = vector.broadcast %cst_27 : f32 to vector<8x1xf32>
    %58 = arith.addf %54, %57 : vector<8x1xf32>
    %59 = math.rsqrt %58 : vector<8x1xf32>
    %60 = vector.broadcast %59 : vector<8x1xf32> to vector<8x128xf32>
    %61 = arith.mulf %56, %60 : vector<8x128xf32>
    %c0_28 = arith.constant 0 : index
    %c0_29 = arith.constant 0 : index
    %62 = vector.load %arg3[%c0_28, %c0_29] : memref<1x128xf32, #tpu.memory_space<vmem>>, vector<1x128xf32>
    %63 = vector.broadcast %62 : vector<1x128xf32> to vector<8x128xf32>
    %64 = arith.mulf %61, %63 : vector<8x128xf32>
    %c0_30 = arith.constant 0 : index
    %c0_31 = arith.constant 0 : index
    %65 = vector.load %arg4[%c0_30, %c0_31] : memref<1x128xf32, #tpu.memory_space<vmem>>, vector<1x128xf32>
    %66 = vector.broadcast %65 : vector<1x128xf32> to vector<8x128xf32>
    %67 = arith.addf %64, %66 : vector<8x128xf32>
    %68 = arith.negf %67 : vector<8x128xf32>
    %69 = math.exp %68 : vector<8x128xf32>
    %cst_32 = arith.constant 1.000000e+00 : f32
    %70 = vector.broadcast %cst_32 : f32 to vector<8x128xf32>
    %71 = arith.addf %70, %69 : vector<8x128xf32>
    %72 = arith.divf %70, %71 : vector<8x128xf32>
    %73 = arith.mulf %67, %72 : vector<8x128xf32>
    %c0_33 = arith.constant 0 : index
    %c0_34 = arith.constant 0 : index
    %74 = vector.load %arg5[%c0_33, %c0_34] : memref<8x128xf32, #tpu.memory_space<vmem>>, vector<8x128xf32>
    tpu.vector_store %arg5[%c0_33, %c0_34], %73 {strides = array<i32>} : memref<8x128xf32, #tpu.memory_space<vmem>>, vector<8x128xf32>,
    return
  }
  func.func @transform_0(%arg0: i32) -> (i32, i32) {
    %c0_i32 = arith.constant 0 : i32
    %c0_i32_0 = arith.constant 0 : i32
    return %arg0, %c0_i32 : i32, i32
  }
  func.func @transform_1(%arg0: i32) -> (i32, i32) {
    %c0_i32 = arith.constant 0 : i32
    %c0_i32_0 = arith.constant 0 : i32
    %c0_i32_1 = arith.constant 0 : i32
    return %c0_i32, %c0_i32_0 : i32, i32
  }
  func.func @transform_2(%arg0: i32) -> (i32, i32) {
    %c0_i32 = arith.constant 0 : i32
    %c0_i32_0 = arith.constant 0 : i32
    %c0_i32_1 = arith.constant 0 : i32
    return %c0_i32, %c0_i32_0 : i32, i32
  }
  func.func @transform_3(%arg0: i32) -> (i32, i32) {
    %c0_i32 = arith.constant 0 : i32
    %c0_i32_0 = arith.constant 0 : i32
    %c0_i32_1 = arith.constant 0 : i32
    return %c0_i32, %c0_i32_0 : i32, i32
  }
  func.func @transform_4(%arg0: i32) -> (i32, i32) {
    %c0_i32 = arith.constant 0 : i32
    %c0_i32_0 = arith.constant 0 : i32
    return %arg0, %c0_i32 : i32, i32
  }
}

</mosaic_0001>

<bundles_post_ra>
// kernel: tpu_custom_call.1
= control target key start
LH: loop header
LB: loop body
LE: loop exit
PB: predicated region body
PF: predicated region fallthrough
CT: control target
= control target key end

     0   :  { %9 = vsyncpa [#allocation4], 0  ;;  %s811_s0 = inlined_call_operand.hbm [shape: f32[8,128], index: 0, kind: input, shape index: {}]   ;;  %s812_s1 = inlined_call_operand.hbm [shape: f32[640,128], index: 1, kind: input, shape index: {}]   ;;  %s813_s2 = inlined_call_operand.vmem [shape: f32[1,128], index: 2, kind: input, shape index: {}]   ;;  %s814_s3 = inlined_call_operand.vmem [shape: f32[1,128], index: 3, kind: input, shape index: {}]   ;;  %s815_s4 = inlined_call_operand.hbm [shape: f32[8,128], index: 4, kind: output, shape index: {}]  }
   0x1   :  { %10 = vsyncpa [#allocation7], 0 }
   0x2   :  { %11 = vsyncpa [#allocation5], 0  ;;  %s728_s15 = smov [#allocation3]   ;;  %s729_s17 = smov [#allocation6]  }
   0x3   :  { %s18_s16 = sshll.u32 %s728_s15, 4  ;;  %s27_s18 = sshll.u32 %s729_s17, 4  ;;  %s19_s16 = int_to_ptr.vmem [resolvable:$true] %s18_s16  ;;  %s762_s18 = int_to_ptr.vmem [resolvable:$true] %s27_s18 }
   0x4   :  { %s656_s21 = scalar_lea.hbm %s811_s0, 128 }
   0x5   :  { %p657_p0 = scmp.ne.s32.totalorder %s811_s0, %s656_s21  ;;  %p660_p1 = scmp.lt.u32.totalorder %s656_s21, %s811_s0 }
   0x7   :  { %p662_p2 = pnand %p660_p1, %p657_p0 }
   0x9   :  { %665 = shalt.err (!%p662_p2)
}
   0xa   :  { %s666_s26 = scalar_lea.vmem %s19_s16, 128  ;;  %p671_p4 = scmp.lt.s32.totalorder %s19_s16, %s19_s16 }
   0xb   :  { %p667_p3 = scmp.ne.s32.totalorder %s19_s16, %s666_s26  ;;  %p672_p5 = scmp.lt.s32.totalorder %s666_s26, %s666_s26 }
   0xd   :  { %p673_p6 = por %p672_p5, %p671_p4 }
   0xf   :  { %p674_p7 = pnand %p673_p6, %p667_p3 }
  0x11   :  { %677 = shalt.err (!%p674_p7)
}
  0x12   :  { %21 = dma.hbm_to_vmem [thread:$0]  %s811_s0, 128, %s19_s16, [#allocation4]  }
  0x13   :  { %s678_s5 = scalar_lea.hbm %s812_s1, 10240 }
  0x14   :  { %p679_p8 = scmp.ne.s32.totalorder %s812_s1, %s678_s5  ;;  %p682_p9 = scmp.lt.u32.totalorder %s678_s5, %s812_s1 }
  0x16   :  { %p684_p10 = pnand %p682_p9, %p679_p8 }
  0x18   :  { %687 = shalt.err (!%p684_p10)
}
  0x19   :  { %s688_s10 = scalar_lea.vmem %s762_s18, 10240  ;;  %p693_p12 = scmp.lt.s32.totalorder %s762_s18, %s762_s18 }
  0x1a   :  { %p689_p11 = scmp.ne.s32.totalorder %s762_s18, %s688_s10  ;;  %p694_p13 = scmp.lt.s32.totalorder %s688_s10, %s688_s10 }
  0x1c   :  { %p695_p0 = por %p694_p13, %p693_p12 }
  0x1e   :  { %p696_p1 = pnand %p695_p0, %p689_p11 }
  0x20   :  { %699 = shalt.err (!%p696_p1)
}
  0x21   :  { %s730_s0 = smov 128   ;;  %s731_s11 = smov 8  }
  0x22   :  { %33 = dma.hbm_to_vmem [thread:$0]  %s812_s1, 10240, %s762_s18, [#allocation7], %s730_s0, %s730_s0, %s731_s11  }
  0x23   :  { %722 = dma.done.wait [#allocation4], 128  }
  0x24   :  { %723 = vsyncadd [#allocation4], 4294967168 }
  0x25   :  { %724 = dma.done.wait [#allocation7], 10240  }
  0x26   :  { %725 = vsyncadd [#allocation7], 4294957056  ;;  %v732_v0 = vmov 1.0   ;;  %v91_v1 = vld [vmem:[#allocation6 + $0x80] sm:$0xff]  ;;  %v92_v2 = vld [vmem:[#allocation6 + $0x88] sm:$0xff]  ;;  %vm734_vm0 = vmmov 0  }
  0x27   :  { %219 = vmatprep.mubr.f32.mxu0 %v732_v0  ;;  %v123_v3 = vld [vmem:[#allocation6 + $0x180] sm:$0xff]  ;;  %v547_v4 = vpack.c.bf16 %v92_v2, %v91_v1  ;;  %v124_v5 = vld [vmem:[#allocation6 + $0x188] sm:$0xff]  ;;  %v93_v12 = vld [vmem:[#allocation6 + $0x90] sm:$0xff]  ;;  %s736_s17 = smov [#allocation8]  }
  0x28   :  { %v75_v6 = vld [vmem:[#allocation6] sm:$0xff]  ;;  %v76_v7 = vld [vmem:[#allocation6 + $0x8] sm:$0xff]  ;;  %v579_v8 = vpack.c.bf16 %v124_v5, %v123_v3  ;;  %v94_v14 = vld [vmem:[#allocation6 + $0x98] sm:$0xff]  ;;  %s410_s18 = sshll.u32 %s736_s17, 4  ;;  %s411_s18 = int_to_ptr.vmem [resolvable:$true] %s410_s18 }
  0x29   :  { %v549_v9 = vpack.c.bf16 %v76_v7, %v75_v6  ;;  %v107_v10 = vld [vmem:[#allocation6 + $0x100] sm:$0xff]  ;;  %v108_v11 = vld [vmem:[#allocation6 + $0x108] sm:$0xff]  ;;  %548 = vmatprep.subr.bf16.mxu0 %v547_v4  ;;  %v125_v15 = vld [vmem:[#allocation6 + $0x190] sm:$0xff]  ;;  %v551_v17 = vpack.c.bf16 %v94_v14, %v93_v12  ;;  %s700_s19 = scalar_lea.vmem %s411_s18, 128  ;;  %p705_p3 = scmp.lt.s32.totalorder %s411_s18, %s411_s18 }
  0x2a   :  { %v581_v13 = vpack.c.bf16 %v108_v11, %v107_v10  ;;  %v126_v16 = vld [vmem:[#allocation6 + $0x198] sm:$0xff]  ;;  %580 = vmatprep.subr.bf16.mxu1 %v579_v8  ;;  %v77_v19 = vld [vmem:[#allocation6 + $0x10] sm:$0xff]  ;;  %v95_v24 = vld [vmem:[#allocation6 + $0xa0] sm:$0xff]  ;;  %p701_p2 = scmp.ne.s32.totalorder %s411_s18, %s700_s19  ;;  %p706_p4 = scmp.lt.s32.totalorder %s700_s19, %s700_s19 }
  0x2b   :  { %550 = vmatpush3.bf16.msra.mxu0 %v549_v9  ;;  %v583_v18 = vpack.c.bf16 %v126_v16, %v125_v15  ;;  %v78_v20 = vld [vmem:[#allocation6 + $0x18] sm:$0xff]  ;;  %v109_v21 = vld [vmem:[#allocation6 + $0x110] sm:$0xff]  ;;  %v96_v25 = vld [vmem:[#allocation6 + $0xa8] sm:$0xff] }
  0x2c   :  { %582 = vmatpush3.bf16.msra.mxu1 %v581_v13  ;;  %v553_v22 = vpack.c.bf16 %v78_v20, %v77_v19  ;;  %v110_v23 = vld [vmem:[#allocation6 + $0x118] sm:$0xff]  ;;  %552 = vmatprep.subr.bf16.mxu0 %v551_v17  ;;  %v555_v27 = vpack.c.bf16 %v96_v25, %v95_v24  ;;  %v127_v28 = vld [vmem:[#allocation6 + $0x1a0] sm:$0xff]  ;;  %v128_v29 = vld [vmem:[#allocation6 + $0x1a8] sm:$0xff]  ;;  %p707_p5 = por %p706_p4, %p705_p3 }
  0x2d   :  { %584 = vmatprep.subr.bf16.mxu1 %v583_v18  ;;  %v585_v26 = vpack.c.bf16 %v110_v23, %v109_v21  ;;  %v79_v30 = vld [vmem:[#allocation6 + $0x20] sm:$0xff]  ;;  %v587_v31 = vpack.c.bf16 %v128_v29, %v127_v28  ;;  %v80_v32 = vld [vmem:[#allocation6 + $0x28] sm:$0xff]  ;;  %v97_v36 = vld [vmem:[#allocation6 + $0xb0] sm:$0xff] }
  0x2e   :  { %v111_v33 = vld [vmem:[#allocation6 + $0x120] sm:$0xff]  ;;  %v112_v34 = vld [vmem:[#allocation6 + $0x128] sm:$0xff]  ;;  %v557_v35 = vpack.c.bf16 %v80_v32, %v79_v30  ;;  %v98_v37 = vld [vmem:[#allocation6 + $0xb8] sm:$0xff]  ;;  %p708_p6 = pnand %p707_p5, %p701_p2 }
  0x2f   :  { %554 = vmatpush3.bf16.msra.mxu0 %v553_v22  ;;  %v129_v38 = vld [vmem:[#allocation6 + $0x1b0] sm:$0xff]  ;;  %v589_v39 = vpack.c.bf16 %v112_v34, %v111_v33  ;;  %v559_v40 = vpack.c.bf16 %v98_v37, %v97_v36  ;;  %v130_v41 = vld [vmem:[#allocation6 + $0x1b8] sm:$0xff]  ;;  %v99_v47 = vld [vmem:[#allocation6 + $0xc0] sm:$0xff] }
  0x30   :  { %586 = vmatpush3.bf16.msra.mxu1 %v585_v26  ;;  %556 = vmatprep.subr.bf16.mxu0 %v555_v27  ;;  %v81_v42 = vld [vmem:[#allocation6 + $0x30] sm:$0xff]  ;;  %v82_v43 = vld [vmem:[#allocation6 + $0x38] sm:$0xff]  ;;  %v591_v44 = vpack.c.bf16 %v130_v41, %v129_v38  ;;  %v100_v48 = vld [vmem:[#allocation6 + $0xc8] sm:$0xff]  ;;  %v733_v38 = vmov 0.0|0.0  }
  0x31   :  { %588 = vmatprep.subr.bf16.mxu1 %v587_v31  ;;  %v113_v45 = vld [vmem:[#allocation6 + $0x130] sm:$0xff]  ;;  %v114_v46 = vld [vmem:[#allocation6 + $0x138] sm:$0xff]  ;;  %v131_v49 = vld [vmem:[#allocation6 + $0x1c0] sm:$0xff]  ;;  %v561_v51 = vpack.c.bf16 %v82_v43, %v81_v42  ;;  %v563_v53 = vpack.c.bf16 %v100_v48, %v99_v47 }
  0x32   :  { %v132_v50 = vld [vmem:[#allocation6 + $0x1c8] sm:$0xff]  ;;  %v593_v52 = vpack.c.bf16 %v114_v46, %v113_v45  ;;  %v83_v54 = vld [vmem:[#allocation6 + $0x40] sm:$0xff]  ;;  %v101_v59 = vld [vmem:[#allocation6 + $0xd0] sm:$0xff] }
  0x33   :  { %558 = vmatpush3.bf16.msra.mxu0 %v557_v35  ;;  %v84_v55 = vld [vmem:[#allocation6 + $0x48] sm:$0xff]  ;;  %v115_v56 = vld [vmem:[#allocation6 + $0x140] sm:$0xff]  ;;  %v595_v57 = vpack.c.bf16 %v132_v50, %v131_v49  ;;  %v102_v60 = vld [vmem:[#allocation6 + $0xd8] sm:$0xff] }
  0x34   :  { %590 = vmatpush3.bf16.msra.mxu1 %v589_v39  ;;  %560 = vmatprep.subr.bf16.mxu0 %v559_v40  ;;  %v116_v58 = vld [vmem:[#allocation6 + $0x148] sm:$0xff]  ;;  %v133_v61 = vld [vmem:[#allocation6 + $0x1d0] sm:$0xff]  ;;  %v134_v62 = vld [vmem:[#allocation6 + $0x1d8] sm:$0xff]  ;;  %v565_v63 = vpack.c.bf16 %v84_v55, %v83_v54  ;;  %v567_v1 = vpack.c.bf16 %v102_v60, %v101_v59 }
  0x35   :  { %592 = vmatprep.subr.bf16.mxu1 %v591_v44  ;;  %v597_v0 = vpack.c.bf16 %v116_v58, %v115_v56  ;;  %v85_v2 = vld [vmem:[#allocation6 + $0x50] sm:$0xff]  ;;  %v86_v3 = vld [vmem:[#allocation6 + $0x58] sm:$0xff]  ;;  %v599_v5 = vpack.c.bf16 %v134_v62, %v133_v61  ;;  %v103_v7 = vld [vmem:[#allocation6 + $0xe0] sm:$0xff] }
  0x36   :  { %v117_v4 = vld [vmem:[#allocation6 + $0x150] sm:$0xff]  ;;  %v118_v6 = vld [vmem:[#allocation6 + $0x158] sm:$0xff]  ;;  %v104_v8 = vld [vmem:[#allocation6 + $0xe8] sm:$0xff]  ;;  %v569_v11 = vpack.c.bf16 %v86_v3, %v85_v2 }
  0x37   :  { %562 = vmatpush3.bf16.msra.mxu0 %v561_v51  ;;  %v135_v9 = vld [vmem:[#allocation6 + $0x1e0] sm:$0xff]  ;;  %v136_v10 = vld [vmem:[#allocation6 + $0x1e8] sm:$0xff]  ;;  %v601_v13 = vpack.c.bf16 %v118_v6, %v117_v4  ;;  %v571_v14 = vpack.c.bf16 %v104_v8, %v103_v7  ;;  %v44_v17 = vld [vmem:[#allocation3] sm:$0xff] }
  0x38   :  { %594 = vmatpush3.bf16.msra.mxu1 %v593_v52  ;;  %564 = vmatprep.subr.bf16.mxu0 %v563_v53  ;;  %v87_v12 = vld [vmem:[#allocation6 + $0x60] sm:$0xff]  ;;  %v88_v15 = vld [vmem:[#allocation6 + $0x68] sm:$0xff]  ;;  %v603_v18 = vpack.c.bf16 %v136_v10, %v135_v9  ;;  %v105_v20 = vld [vmem:[#allocation6 + $0xf0] sm:$0xff]  ;;  %644 = vtanh.f32 %v44_v17  ;;  %v420_v22 = vmul.f32 -1.442695, %v44_v17  ;;  %v735_v52 = vmov 0.0  }
  0x39   :  { %596 = vmatprep.subr.bf16.mxu1 %v595_v57  ;;  %v119_v16 = vld [vmem:[#allocation6 + $0x160] sm:$0xff]  ;;  %v120_v19 = vld [vmem:[#allocation6 + $0x168] sm:$0xff]  ;;  %v106_v21 = vld [vmem:[#allocation6 + $0xf8] sm:$0xff]  ;;  %v573_v25 = vpack.c.bf16 %v88_v15, %v87_v12 }
  0x3a   :  { %v137_v23 = vld [vmem:[#allocation6 + $0x1f0] sm:$0xff]  ;;  %v138_v24 = vld [vmem:[#allocation6 + $0x1f8] sm:$0xff]  ;;  %646 = vpow2.f32 %v420_v22  ;;  %v605_v26 = vpack.c.bf16 %v120_v19, %v119_v16  ;;  %v575_v27 = vpack.c.bf16 %v106_v21, %v105_v20  ;;  %v139_v44 = vld [vmem:[#allocation6 + $0x200] sm:$0xff]  ;;  %v369_v21 = vlaneseq }
  0x3b   :  { %566 = vmatpush3.bf16.msra.mxu0 %v565_v63  ;;  %v89_v28 = vld [vmem:[#allocation6 + $0x70] sm:$0xff]  ;;  %v90_v29 = vld [vmem:[#allocation6 + $0x78] sm:$0xff]  ;;  %v607_v30 = vpack.c.bf16 %v138_v24, %v137_v23  ;;  %v140_v45 = vld [vmem:[#allocation6 + $0x208] sm:$0xff] }
  0x3c   :  { %598 = vmatpush3.bf16.msra.mxu1 %v597_v0  ;;  %568 = vmatprep.subr.bf16.mxu0 %v567_v1  ;;  %v121_v31 = vld [vmem:[#allocation6 + $0x170] sm:$0xff]  ;;  %v122_v32 = vld [vmem:[#allocation6 + $0x178] sm:$0xff]  ;;  %v577_v33 = vpack.c.bf16 %v90_v29, %v89_v28  ;;  %v612_v47 = vpack.c.bf16 %v140_v45, %v139_v44  ;;  %v143_v53 = vld [vmem:[#allocation6 + $0x220] sm:$0xff]  ;;  %v370_v22 = vand.u32 127, %v369_v21 }
  0x3d   :  { %600 = vmatprep.subr.bf16.mxu1 %v599_v5  ;;  %v609_v34 = vpack.c.bf16 %v122_v32, %v121_v31  ;;  %v141_v49 = vld [vmem:[#allocation6 + $0x210] sm:$0xff]  ;;  %v142_v50 = vld [vmem:[#allocation6 + $0x218] sm:$0xff]  ;;  %v144_v54 = vld [vmem:[#allocation6 + $0x228] sm:$0xff] }
  0x3e   :  { %v615_v51 = vpack.c.bf16 %v142_v50, %v141_v49  ;;  %v618_v55 = vpack.c.bf16 %v144_v54, %v143_v53  ;;  %v145_v56 = vld [vmem:[#allocation6 + $0x230] sm:$0xff]  ;;  %v146_v57 = vld [vmem:[#allocation6 + $0x238] sm:$0xff]  ;;  %v147_v59 = vld [vmem:[#allocation6 + $0x240] sm:$0xff]  ;;  %vm371_vm1 = vcmp.lt.s32.totalorder %v370_v22, 32 }
  0x3f   :  { %570 = vmatpush3.bf16.msra.mxu0 %v569_v11  ;;  %v621_v58 = vpack.c.bf16 %v146_v57, %v145_v56  ;;  %v148_v60 = vld [vmem:[#allocation6 + $0x248] sm:$0xff]  ;;  %v149_v62 = vld [vmem:[#allocation6 + $0x250] sm:$0xff]  ;;  %v150_v63 = vld [vmem:[#allocation6 + $0x258] sm:$0xff] }
  0x40   :  { %602 = vmatpush3.bf16.msra.mxu1 %v601_v13  ;;  %572 = vmatprep.subr.bf16.mxu0 %v571_v14  ;;  %v624_v61 = vpack.c.bf16 %v148_v60, %v147_v59  ;;  %v627_v0 = vpack.c.bf16 %v150_v63, %v149_v62  ;;  %v151_v1 = vld [vmem:[#allocation6 + $0x260] sm:$0xff]  ;;  %v152_v2 = vld [vmem:[#allocation6 + $0x268] sm:$0xff]  ;;  %v153_v5 = vld [vmem:[#allocation6 + $0x270] sm:$0xff] }
  0x41   :  { %604 = vmatprep.subr.bf16.mxu1 %v603_v18  ;;  %v630_v4 = vpack.c.bf16 %v152_v2, %v151_v1  ;;  %v154_v6 = vld [vmem:[#allocation6 + $0x278] sm:$0xff] }
  0x42   :  { %v645_v35 = vpop.eup %644  ;;  %v633_v9 = vpack.c.bf16 %v154_v6, %v153_v5  ;;  %v422_v32 = vld [vmem:[%s813_s2] ss:$0 sm:$0xff] }
  0x43   :  { %574 = vmatpush3.bf16.msra.mxu0 %v573_v25  ;;  %v55_v36 = vmul.f32 4.0, %v645_v35  ;;  %v59_v37 = vmul.f32 1.875, %v645_v35  ;;  %v64_v3 = vmul.f32 1.8666667, %v645_v35 }
  0x44   :  { %606 = vmatpush3.bf16.msra.mxu1 %v605_v26  ;;  %576 = vmatprep.subr.bf16.mxu0 %v575_v27  ;;  %v647_v39 = vpop.eup %646 }
  0x45   :  { %608 = vmatprep.subr.bf16.mxu1 %v607_v30  ;;  %v57_v40 = vmul.f32 0.5, %v55_v36  ;;  %v48_v41 = vadd.f32 1.0, %v647_v39 }
  0x47   :  { %578 = vmatpush3.bf16.msra.mxu0 %v577_v33  ;;  %v61_v42 = vmul.f32 %v59_v37, %v57_v40  ;;  %648 = vrcp.f32 %v48_v41  ;;  %v67_v8 = vmul.f32 0.8, %v57_v40 }
  0x48   :  { %610 = vmatpush3.bf16.msra.mxu1 %v609_v34  ;;  %611 = vmatprep.subr.bf16.mxu0 %v733_v38  ;;  %v423_v34 = vld [vmem:[%s814_s3] ss:$0 sm:$0xff] }
  0x49   :  { %v421_v43 = vadd.f32 -0.75, %v61_v42 }
  0x4b   :  { %289 = vmatprep.mubr.f32.mxu1 %v421_v43  ;;  %v66_v7 = vmul.f32 %v421_v43, %v64_v3 }
  0x4c   :  { %290 = vmatmul.mubr.f32.vlgmr.msra.gmra.mrb[0].mxu1 %v57_v40 }
  0x4d   :  { %v68_v10 = vsub.f32 %v66_v7, %v67_v8 }
  0x51   :  { %v649_v46 = vpop.eup %648 }
  0x52   :  { %v51_v48 = vmul.f32 %v649_v46, %v44_v17 }
  0x54   :  { %220 = vmatmul.mubr.f32.vlgmr.msra.gmra.mrb[0].mxu0 %v51_v48 }
  0x55   :  { %613 = vmatpush3.bf16.msra.mxu0 %v612_v47  ;;  %544 = vmatprep.mubr.msk.f32.mxu0 %vm734_vm0, %v735_v52 }
  0x56   :  { %614 = vmatprep.subr.bf16.mxu0 %v733_v38 }
  0x59   :  { %616 = vmatpush3.bf16.msra.mxu0 %v615_v51 }
  0x5a   :  { %617 = vmatprep.subr.bf16.mxu0 %v733_v38 }
  0x5d   :  { %619 = vmatpush3.bf16.msra.mxu0 %v618_v55 }
  0x5e   :  { %620 = vmatprep.subr.bf16.mxu0 %v733_v38 }
  0x61   :  { %622 = vmatpush3.bf16.msra.mxu0 %v621_v58 }
  0x62   :  { %623 = vmatprep.subr.bf16.mxu0 %v733_v38 }
  0x65   :  { %625 = vmatpush3.bf16.msra.mxu0 %v624_v61 }
  0x66   :  { %626 = vmatprep.subr.bf16.mxu0 %v733_v38 }
  0x69   :  { %628 = vmatpush3.bf16.msra.mxu0 %v627_v0 }
  0x6a   :  { %629 = vmatprep.subr.bf16.mxu0 %v733_v38 }
  0x6d   :  { %631 = vmatpush3.bf16.msra.mxu0 %v630_v4 }
  0x6e   :  { %632 = vmatprep.subr.bf16.mxu0 %v733_v38 }
  0x71   :  { %634 = vmatpush3.bf16.msra.mxu0 %v633_v9 }
  0x74   :  { %545 = vmatmul.mubr.f32.vlgmr.msra.gmra.mrb[2].mxu0 %v68_v10 }
 0x11f   :  { %v492_v11 = vpop.f32.mrb[0].mxu1 }
 0x120   :  { %v493_v12 = vpop.f32.mrb[1].mxu1 }
 0x121   :  { %v494_v13 = vadd.f32 %v493_v12, %v492_v11 }
 0x127   :  { %v457_v14 = vpop.f32.mrb[0].mxu0 }
 0x128   :  { %v458_v15 = vpop.f32.mrb[1].mxu0 }
 0x129   :  { %v459_v16 = vadd.f32 %v458_v15, %v457_v14 }
 0x12b   :  { %v292_v17 = vadd.f32 %v494_v13, %v459_v16 }
 0x147   :  { %v361_v18 = vpop.f32.mrb[2].mxu0 }
 0x148   :  { %v362_v19 = vadd.f32 %v361_v18, %v292_v17  ;;  %v546_v20 = vpop.f32.mrb[3].mxu0 }
 0x14a   :  { %365 = vadd.xlane.f32.xlu0 %v362_v19 }
 0x1d7   :  { %v366_v23 = vpop.xlane.xlu0 %365 }
 0x1d8   :  { %v367_v24 = vmul.f32 0.03125, %v366_v23 }
 0x1da   :  { %v368_v25 = vsub.f32 %v362_v19, %v367_v24 }
 0x1dc   :  { %v372_v26 = vsel %vm371_vm1, %v368_v25, 0.0 }
 0x1dd   :  { %v373_v27 = vmul.f32 %v372_v26, %v372_v26 }
 0x1df   :  { %374 = vadd.xlane.f32.xlu0 %v373_v27 }
 0x26c   :  { %v375_v28 = vpop.xlane.xlu0 %374 }
 0x26d   :  { %v376_v29 = vmul.f32 0.03125, %v375_v28 }
 0x26f   :  { %v377_v30 = vadd.f32 1e-05, %v376_v29 }
 0x271   :  { %650 = vrsqrt.f32 %v377_v30 }
 0x27b   :  { %v651_v31 = vpop.eup %650 }
 0x27c   :  { %v379_v33 = vmul.f32 %v651_v31, %v368_v25 }
 0x27e   :  { %v387_v35 = vmul.f32 %v422_v32, %v379_v33 }
 0x280   :  { %v395_v36 = vadd.f32 %v423_v34, %v387_v35 }
 0x282   :  { %v424_v37 = vmul.f32 -1.442695, %v395_v36 }
 0x284   :  { %652 = vpow2.f32 %v424_v37 }
 0x28e   :  { %v653_v38 = vpop.eup %652 }
 0x28f   :  { %v399_v39 = vadd.f32 1.0, %v653_v38 }
 0x291   :  { %654 = vrcp.f32 %v399_v39 }
 0x29b   :  { %v655_v40 = vpop.eup %654 }
 0x29c   :  { %v402_v41 = vmul.f32 %v655_v40, %v395_v36 }
 0x29e   :  { %403 = vst [vmem:[#allocation8] sm:$0xff] %v402_v41 }
 0x29f   :  { %711 = shalt.err (!%p708_p6)
}
 0x2a0   :  { %s712_s20 = scalar_lea.hbm %s815_s4, 128 }
 0x2a1   :  { %p713_p7 = scmp.ne.s32.totalorder %s815_s4, %s712_s20  ;;  %p716_p8 = scmp.lt.u32.totalorder %s712_s20, %s815_s4 }
 0x2a3   :  { %p718_p9 = pnand %p716_p8, %p713_p7 }
 0x2a5   :  { %721 = shalt.err (!%p718_p9)
}
 0x2a6   :  { %413 = dma.vmem_to_hbm [thread:$0]  %s411_s18, 128, %s815_s4, [#allocation5]  }
 0x2a7   :  { %726 = dma.done.wait [#allocation5], 128  }
 0x2a8   :  { %727 = vsyncadd [#allocation5], 4294967168 }
 0x2a9   :  { %417 = vsyncpa [#allocation4], 1 }
 0x2aa   :  { %418 = vsyncpa [#allocation7], 1 }
 0x2ab   :  { %419 = vsyncpa [#allocation5], 1 }

</bundles_post_ra>
